<compile_context>
chip_gen: v5e
topology: v5e:2x2
jax: 0.10.0
libtpu: 0.0.40
codegen_flags: <defaults>
</compile_context>

<pallas_src>
import functools

import jax
import jax.numpy as jnp
import numpy as np
from jax.experimental import pallas as pl
from jax.experimental.pallas import tpu as pltpu

EPS = 1e-5
# Known-good everywhere (v5e scoped default is only 16 MiB; v7x physical VMEM is 64 MiB).
VMEM_LIMIT_BYTES = 32 * 1024 * 1024


def _round_up(x, m):
    return -(-x // m) * m


# ------------- Kernel A: BN1 + ReLU + 1x1 conv + fused BN2 partial statistics -------------
def bn_relu_conv1x1_kernel(x_ref, scale_ref, shift_ref, w_ref, o_ref, stats_ref,
                           *, m_valid, tm, needs_mask, mxu_dtype):
    i = pl.program_id(0)
    x = x_ref[...]                                                    # (tm, Cin) f32
    a = jnp.maximum(x * scale_ref[...] + shift_ref[...], 0.0)         # fused BN1 + ReLU (VPU)
    b = jnp.dot(a.astype(mxu_dtype), w_ref[...],
                preferred_element_type=jnp.float32)                   # (tm, Cmid) f32 acc
    o_ref[...] = b.astype(o_ref.dtype)                                # bf16 intermediate (fast path)

    # Fused BN2 batch-statistic partials (sum / sum-of-squares), from the f32 accumulator.
    def write_stats(bv):
        s1 = jnp.sum(bv, axis=0, keepdims=True)                       # (1, Cmid)
        s2 = jnp.sum(bv * bv, axis=0, keepdims=True)                  # (1, Cmid)
        stats_ref[0] = jnp.concatenate([s1, s2], axis=0)              # (2, Cmid)

    if needs_mask:
        # Only tiles that actually contain zero-padded tail rows pay for the iota/select.
        has_pad = (i + 1) * tm > m_valid

        @pl.when(has_pad)
        def _():
            row = i * tm + jax.lax.broadcasted_iota(jnp.int32, (tm, 1), 0)
            write_stats(jnp.where(row < m_valid, b, 0.0))

        @pl.when(jnp.logical_not(has_pad))
        def _():
            write_stats(b)
    else:
        write_stats(b)


def bn_relu_conv1x1(x2d, scale, shift, w, *, m_valid, tm, inter_dtype, mxu_dtype):
    Mp, Cin = x2d.shape
    Cmid = w.shape[1]
    grid = Mp // tm
    kern = functools.partial(bn_relu_conv1x1_kernel, m_valid=m_valid, tm=tm,
                             needs_mask=(Mp != m_valid), mxu_dtype=mxu_dtype)
    return pl.pallas_call(
        kern,
        out_shape=(jax.ShapeDtypeStruct((Mp, Cmid), inter_dtype),
                   jax.ShapeDtypeStruct((grid, 2, Cmid), jnp.float32)),
        grid_spec=pltpu.PrefetchScalarGridSpec(
            num_scalar_prefetch=0,
            grid=(grid,),
            in_specs=[
                pl.BlockSpec((tm, Cin), lambda i: (i, 0)),
                pl.BlockSpec((1, Cin), lambda i: (0, 0)),
                pl.BlockSpec((1, Cin), lambda i: (0, 0)),
                pl.BlockSpec((Cin, Cmid), lambda i: (0, 0)),
            ],
            out_specs=(
                pl.BlockSpec((tm, Cmid), lambda i: (i, 0)),
                pl.BlockSpec((1, 2, Cmid), lambda i: (i, 0, 0)),
            ),
        ),
        compiler_params=pltpu.CompilerParams(
            dimension_semantics=("parallel",),
            vmem_limit_bytes=VMEM_LIMIT_BYTES),
    )(x2d, scale, shift, w)


# ------------- Kernel B: BN2 + ReLU + 3x3 conv (padding=1), folded taps, lane-dense out ----
def bn_relu_conv3x3_kernel(x_ref, scale_ref, shift_ref, w_ref, o_ref, acc_ref,
                           *, nb, H, W, c_out, c_pad, mxu_dtype):
    hw = H * W
    Cm = x_ref.shape[-1]

    # Fused BN2 + ReLU in f32 on the flat (nb*hw, Cm) block read straight from kernel A.
    a = jnp.maximum(x_ref[...].astype(jnp.float32) * scale_ref[...] + shift_ref[...], 0.0)
    a3 = a.reshape(nb * H, W, Cm)                 # (image-rows, W, Cm); W-shifts stay per row
    zc = jnp.zeros((nb * H, 1, Cm), jnp.float32)
    body = (H - 1) * W

    for kw in range(3):                           # dw = kw - 1
        if kw == 0:
            slab = jnp.concatenate([zc, a3[:, :W - 1, :]], axis=1)    # a[.., w-1], 0 at w=0
        elif kw == 1:
            slab = a3
        else:
            slab = jnp.concatenate([a3[:, 1:, :], zc], axis=1)        # a[.., w+1], 0 at w=W-1
        s = slab.reshape(nb * hw, Cm).astype(mxu_dtype)

        # One fat dot per kw: the 3 kh taps are folded into the N dim, each in its own
        # 128-lane-aligned (c_pad) slice of the pre-folded weight slab.
        c = jnp.dot(s, w_ref[kw], preferred_element_type=jnp.float32)  # (nb*hw, 3*c_pad)

        # kh = 1 (dh = 0): contributes to every output row; first tap initializes acc
        # (no separate zeroing pass, no reliance on grid-step ordering).
        if kw == 0:
            acc_ref[...] = c[:, c_pad:2 * c_pad]
        else:
            acc_ref[...] += c[:, c_pad:2 * c_pad]

        if H > 1:
            for b in range(nb):                   # row-ranged adds stay inside each image
                r0 = b * hw
                # kh = 0 (input row h-1) -> output rows 1 .. H-1
                acc_ref[r0 + W:r0 + hw, :] += c[r0:r0 + body, 0:c_pad]
                # kh = 2 (input row h+1) -> output rows 0 .. H-2
                acc_ref[r0:r0 + body, :] += c[r0 + W:r0 + hw, 2 * c_pad:3 * c_pad]

    # Single store: only the valid channels, relayout once to a lane-dense (W*c_out) axis.
    o_ref[...] = acc_ref[:, 0:c_out].reshape(nb, H, W * c_out)


def bn_relu_conv3x3(b2d, scale, shift, w_fold, *, n_img, nb, H, W, c_out, c_pad, mxu_dtype):
    Mp, Cm = b2d.shape
    hw = H * W
    grid = -(-n_img // nb)
    kern = functools.partial(bn_relu_conv3x3_kernel, nb=nb, H=H, W=W,
                             c_out=c_out, c_pad=c_pad, mxu_dtype=mxu_dtype)
    return pl.pallas_call(
        kern,
        out_shape=jax.ShapeDtypeStruct((grid * nb, H, W * c_out), jnp.float32),
        grid_spec=pltpu.PrefetchScalarGridSpec(
            num_scalar_prefetch=0,
            grid=(grid,),
            in_specs=[
                pl.BlockSpec((nb * hw, Cm), lambda n: (n, 0)),         # reads A's output in place
                pl.BlockSpec((1, Cm), lambda n: (0, 0)),
                pl.BlockSpec((1, Cm), lambda n: (0, 0)),
                pl.BlockSpec((3, Cm, 3 * c_pad), lambda n: (0, 0, 0)),  # lane-dense weight slab
            ],
            out_specs=pl.BlockSpec((nb, H, W * c_out), lambda n: (n, 0, 0)),
            scratch_shapes=[pltpu.VMEM((nb * hw, c_pad), jnp.float32)],  # lane-aligned f32 acc
        ),
        compiler_params=pltpu.CompilerParams(
            dimension_semantics=("parallel",),
            vmem_limit_bytes=VMEM_LIMIT_BYTES),
    )(b2d, scale, shift, w_fold)


# ----------------------------- wrapper helpers ----------------------------
def _pick_images_per_block(N, H, W):
    """Images per kernel-B grid step: enough rows to amortize per-step overhead,
    a multiple-of-8 flattened row count (sublane tiling), and >= 2 grid steps when
    the batch allows it so megacore / v7x 2-TC parts can split the grid."""
    hw = H * W
    max_nb = max(1, N // 2)
    nb = 1
    while nb < max_nb and nb * hw < 512:
        nb += 1
    while (nb * hw) % 8 != 0:
        nb += 1
    return nb


# ----------------------------- DenseLayer forward ----------------------------
def dense_layer_forward(x_nchw, params, *, drop_rate=0.0, tm=1024, mxu_dtype=jnp.bfloat16):
    """x_nchw: (N, Cin, H, W) f32 -> (N, growth_rate, H, W) f32."""
    if drop_rate > 0.0:
        raise NotImplementedError("TODO(synk): drop_rate > 0 dropout not implemented")

    x = jnp.transpose(x_nchw, (0, 2, 3, 1)).astype(jnp.float32)       # NCHW -> NHWC
    N, H, W, Cin = x.shape
    Cmid = params["w1"].shape[1]
    Cout = params["w2"].shape[-1]
    c_pad = _round_up(Cout, 128)                                      # full-lane output width
    hw = H * W
    M = N * hw

    # norm1 (training-mode batch stats) folded to scale/shift (tiny reduction in glue).
    mean1 = jnp.mean(x, axis=(0, 1, 2))
    var1 = jnp.var(x, axis=(0, 1, 2))
    scale1 = params["gamma1"] / jnp.sqrt(var1 + EPS)
    shift1 = params["beta1"] - mean1 * scale1

    # Shared row bookkeeping: kernel B reads kernel A's padded output directly, so the row
    # count must cover both kernels' tilings.  The common case needs no padding at all.
    nb = _pick_images_per_block(N, H, W)
    grid_b = -(-N // nb)
    Mb = grid_b * nb * hw                                             # rows kernel B addresses
    tm = min(tm, _round_up(Mb, 8))                                    # v6e likes tm=1024
    Mp = _round_up(Mb, tm)

    x2d = x.reshape(M, Cin)
    if Mp != M:
        x2d = jnp.pad(x2d, ((0, Mp - M), (0, 0)))

    inter_dtype = mxu_dtype                                           # bf16 intermediate (fast path)
    w1 = params["w1"].astype(mxu_dtype)
    b2d, stats = bn_relu_conv1x1(x2d, scale1[None, :], shift1[None, :], w1,
                                 m_valid=M, tm=tm, inter_dtype=inter_dtype,
                                 mxu_dtype=mxu_dtype)

    # norm2 batch stats from kernel A's fused f32 partials (no extra HBM pass over b).
    s1 = jnp.sum(stats[:, 0, :], axis=0)
    s2 = jnp.sum(stats[:, 1, :], axis=0)
    mean2 = s1 / M
    var2 = jnp.maximum(s2 / M - mean2 * mean2, 0.0)                   # biased variance
    scale2 = params["gamma2"] / jnp.sqrt(var2 + EPS)
    shift2 = params["beta2"] - mean2 * scale2

    # Pre-fold conv2 weights to a lane-dense slab: w_fold[kw, ci, kh*c_pad + co] = w2[kh,kw,ci,co].
    w2 = params["w2"]
    w_fold = jnp.zeros((3, Cmid, 3 * c_pad), jnp.float32)
    for kh in range(3):
        w_fold = w_fold.at[:, :, kh * c_pad:kh * c_pad + Cout].set(w2[kh])
    w_fold = w_fold.astype(mxu_dtype)

    y = bn_relu_conv3x3(b2d, scale2[None, :], shift2[None, :], w_fold,
                        n_img=N, nb=nb, H=H, W=W, c_out=Cout, c_pad=c_pad,
                        mxu_dtype=mxu_dtype)
    y = y[:N].reshape(N, H, W, Cout)
    # drop_rate == 0 -> dropout is identity
    return jnp.transpose(y, (0, 3, 1, 2))                             # NHWC -> NCHW


# ----------------------------- pure-JAX reference ----------------------------
def ref_forward(x_nchw, params):
    x = x_nchw
    mean1 = jnp.mean(x, axis=(0, 2, 3))
    var1 = jnp.var(x, axis=(0, 2, 3))
    xn = (x - mean1[None, :, None, None]) / jnp.sqrt(var1 + EPS)[None, :, None, None]
    xn = xn * params["gamma1"][None, :, None, None] + params["beta1"][None, :, None, None]
    a = jnp.maximum(xn, 0.0)
    w1_oihw = jnp.transpose(params["w1"])[:, :, None, None]           # (Cmid, Cin, 1, 1)
    b = jax.lax.conv_general_dilated(a, w1_oihw, (1, 1), "VALID",
                                     dimension_numbers=("NCHW", "OIHW", "NCHW"))
    mean2 = jnp.mean(b, axis=(0, 2, 3))
    var2 = jnp.var(b, axis=(0, 2, 3))
    bn = (b - mean2[None, :, None, None]) / jnp.sqrt(var2 + EPS)[None, :, None, None]
    bn = bn * params["gamma2"][None, :, None, None] + params["beta2"][None, :, None, None]
    a2 = jnp.maximum(bn, 0.0)
    w2_oihw = jnp.transpose(params["w2"], (3, 2, 0, 1))               # (Cout, Cmid, 3, 3)
    y = jax.lax.conv_general_dilated(a2, w2_oihw, (1, 1), ((1, 1), (1, 1)),
                                     dimension_numbers=("NCHW", "OIHW", "NCHW"))
    return y


if __name__ == "__main__":
    key = jax.random.PRNGKey(0)
    N, Cin, H, W = 2, 8, 16, 16
    growth_rate, bn_size, drop_rate = 8, 4, 0.0
    Cmid, Cout = bn_size * growth_rate, growth_rate

    ks = jax.random.split(key, 7)
    params = dict(
        gamma1=jax.random.uniform(ks[0], (Cin,), jnp.float32, 0.5, 1.5),
        beta1=0.1 * jax.random.normal(ks[1], (Cin,), jnp.float32),
        w1=0.1 * jax.random.normal(ks[2], (Cin, Cmid), jnp.float32),         # conv1 (1x1), no bias
        gamma2=jax.random.uniform(ks[3], (Cmid,), jnp.float32, 0.5, 1.5),
        beta2=0.1 * jax.random.normal(ks[4], (Cmid,), jnp.float32),
        w2=0.1 * jax.random.normal(ks[5], (3, 3, Cmid, Cout), jnp.float32),  # conv2 (3x3) HWIO, no bias
    )
    x = jax.random.normal(ks[6], (N, Cin, H, W), jnp.float32)

    y_ref = jax.block_until_ready(ref_forward(x, params))

    # Exact-precision path (f32 MXU operands + f32 intermediate): tight numerical check.
    y_f32 = jax.block_until_ready(dense_layer_forward(x, params, drop_rate=drop_rate,
                                                      mxu_dtype=jnp.float32))
    assert y_f32.shape == (N, Cout, H, W), y_f32.shape
    err_f32 = float(np.abs(np.asarray(y_f32) - np.asarray(y_ref)).max())
    assert np.allclose(np.asarray(y_f32), np.asarray(y_ref), atol=2e-4, rtol=2e-4), err_f32

    # Fast path (bf16 MXU operands + bf16 intermediate, f32 accumulation): looser tolerance.
    y_bf16 = jax.block_until_ready(dense_layer_forward(x, params, drop_rate=drop_rate,
                                                       mxu_dtype=jnp.bfloat16))
    assert y_bf16.shape == (N, Cout, H, W), y_bf16.shape
    err_bf16 = float(np.abs(np.asarray(y_bf16) - np.asarray(y_ref)).max())
    assert np.allclose(np.asarray(y_bf16), np.asarray(y_ref), atol=1e-1, rtol=1e-1), err_bf16

    print("KERNEL_OK")
</pallas_src>

<mosaic_0001>
module attributes {stable_mosaic.version = 11 : i64} {
  func.func @bn_relu_conv1x1_kernel(%arg0: i32, %arg1: memref<512x8xf32, #tpu.memory_space<vmem>>, %arg2: memref<1x8xf32, #tpu.memory_space<vmem>>, %arg3: memref<1x8xf32, #tpu.memory_space<vmem>>, %arg4: memref<8x32xf32, #tpu.memory_space<vmem>>, %arg5: memref<512x32xf32, #tpu.memory_space<vmem>>, %arg6: memref<1x2x32xf32, #tpu.memory_space<vmem>>) attributes {dimension_semantics = [#tpu.dimension_semantics<parallel>], iteration_bounds = array<i64: 1>, scalar_prefetch = 0 : i64, scratch_operands = 0 : i64, tpu.core_type = #tpu.core_type<tc>, window_params = [{transform_indices = @transform_0, window_bounds = array<i64: 512, 8>}, {pipeline_mode = #tpu.pipeline_mode<synchronous>, transform_indices = @transform_1, window_bounds = array<i64: 1, 8>}, {pipeline_mode = #tpu.pipeline_mode<synchronous>, transform_indices = @transform_2, window_bounds = array<i64: 1, 8>}, {pipeline_mode = #tpu.pipeline_mode<synchronous>, transform_indices = @transform_3, window_bounds = array<i64: 8, 32>}, {transform_indices = @transform_4, window_bounds = array<i64: 512, 32>}, {transform_indices = @transform_5, window_bounds = array<i64: 1, 2, 32>}]} {
    %c0 = arith.constant 0 : index
    %c0_0 = arith.constant 0 : index
    %0 = vector.load %arg1[%c0, %c0_0] : memref<512x8xf32, #tpu.memory_space<vmem>>, vector<512x8xf32>
    %c0_1 = arith.constant 0 : index
    %c0_2 = arith.constant 0 : index
    %1 = vector.load %arg2[%c0_1, %c0_2] : memref<1x8xf32, #tpu.memory_space<vmem>>, vector<1x8xf32>
    %2 = vector.broadcast %1 : vector<1x8xf32> to vector<512x8xf32>
    %3 = arith.mulf %0, %2 : vector<512x8xf32>
    %c0_3 = arith.constant 0 : index
    %c0_4 = arith.constant 0 : index
    %4 = vector.load %arg3[%c0_3, %c0_4] : memref<1x8xf32, #tpu.memory_space<vmem>>, vector<1x8xf32>
    %5 = vector.broadcast %4 : vector<1x8xf32> to vector<512x8xf32>
    %6 = arith.addf %3, %5 : vector<512x8xf32>
    %cst = arith.constant 0.000000e+00 : f32
    %7 = vector.broadcast %cst : f32 to vector<512x8xf32>
    %8 = arith.maximumf %6, %7 : vector<512x8xf32>
    %c0_5 = arith.constant 0 : index
    %c0_6 = arith.constant 0 : index
    %9 = vector.load %arg4[%c0_5, %c0_6] : memref<8x32xf32, #tpu.memory_space<vmem>>, vector<8x32xf32>
    %cst_7 = arith.constant dense<0.000000e+00> : vector<512x32xf32>
    %10 = tpu.matmul %8, %9, %cst_7 {dimension_numbers = #tpu.dot_dimension_numbers<[1], [0], [0], [1], [0, 0, 1, 1], [], []>} : vector<512x8xf32>, vector<8x32xf32>, vector<512x32xf32> -> vector<512x32xf32>
    %c0_8 = arith.constant 0 : index
    %c0_9 = arith.constant 0 : index
    %11 = vector.load %arg5[%c0_8, %c0_9] : memref<512x32xf32, #tpu.memory_space<vmem>>, vector<512x32xf32>
    tpu.vector_store %arg5[%c0_8, %c0_9], %10 {strides = array<i32>} : memref<512x32xf32, #tpu.memory_space<vmem>>, vector<512x32xf32>,
    %cst_10 = arith.constant dense<0.000000e+00> : vector<32xf32>
    %12 = vector.multi_reduction <add>, %10, %cst_10 [0] : vector<512x32xf32> to vector<32xf32>
    %13 = vector.shape_cast %12 : vector<32xf32> to vector<1x32xf32>
    %14 = arith.mulf %10, %10 : vector<512x32xf32>
    %cst_11 = arith.constant dense<0.000000e+00> : vector<32xf32>
    %15 = vector.multi_reduction <add>, %14, %cst_11 [0] : vector<512x32xf32> to vector<32xf32>
    %16 = vector.shape_cast %15 : vector<32xf32> to vector<1x32xf32>
    %17 = tpu.concatenate %13, %16 in 0 : vector<1x32xf32>, vector<1x32xf32> -> vector<2x32xf32>
    %c0_12 = arith.constant 0 : index
    %c0_13 = arith.constant 0 : index
    %c0_14 = arith.constant 0 : index
    %18 = vector.load %arg6[%c0_12, %c0_13, %c0_14] : memref<1x2x32xf32, #tpu.memory_space<vmem>>, vector<1x2x32xf32>
    %19 = vector.shape_cast %18 : vector<1x2x32xf32> to vector<2x32xf32>
    %20 = vector.shape_cast %17 : vector<2x32xf32> to vector<1x2x32xf32>
    tpu.vector_store %arg6[%c0_12, %c0_13, %c0_14], %20 {strides = array<i32>} : memref<1x2x32xf32, #tpu.memory_space<vmem>>, vector<1x2x32xf32>,
    return
  }
  func.func @transform_0(%arg0: i32) -> (i32, i32) {
    %c0_i32 = arith.constant 0 : i32
    %c0_i32_0 = arith.constant 0 : i32
    return %arg0, %c0_i32 : i32, i32
  }
  func.func @transform_1(%arg0: i32) -> (i32, i32) {
    %c0_i32 = arith.constant 0 : i32
    %c0_i32_0 = arith.constant 0 : i32
    %c0_i32_1 = arith.constant 0 : i32
    return %c0_i32, %c0_i32_0 : i32, i32
  }
  func.func @transform_2(%arg0: i32) -> (i32, i32) {
    %c0_i32 = arith.constant 0 : i32
    %c0_i32_0 = arith.constant 0 : i32
    %c0_i32_1 = arith.constant 0 : i32
    return %c0_i32, %c0_i32_0 : i32, i32
  }
  func.func @transform_3(%arg0: i32) -> (i32, i32) {
    %c0_i32 = arith.constant 0 : i32
    %c0_i32_0 = arith.constant 0 : i32
    %c0_i32_1 = arith.constant 0 : i32
    return %c0_i32, %c0_i32_0 : i32, i32
  }
  func.func @transform_4(%arg0: i32) -> (i32, i32) {
    %c0_i32 = arith.constant 0 : i32
    %c0_i32_0 = arith.constant 0 : i32
    return %arg0, %c0_i32 : i32, i32
  }
  func.func @transform_5(%arg0: i32) -> (i32, i32, i32) {
    %c0_i32 = arith.constant 0 : i32
    %c0_i32_0 = arith.constant 0 : i32
    %c0_i32_1 = arith.constant 0 : i32
    return %arg0, %c0_i32, %c0_i32_0 : i32, i32, i32
  }
}

</mosaic_0001>

<bundles_post_ra>
// kernel: tpu_custom_call.1
= control target key start
LH: loop header
LB: loop body
LE: loop exit
PB: predicated region body
PF: predicated region fallthrough
CT: control target
= control target key end

     0   :  { %s2317_s0 = inlined_call_operand.vmem [shape: f32[512,8], index: 0, kind: input, shape index: {}]   ;;  %s2318_s1 = inlined_call_operand.vmem [shape: f32[1,8], index: 1, kind: input, shape index: {}]   ;;  %s2319_s2 = inlined_call_operand.vmem [shape: f32[1,8], index: 2, kind: input, shape index: {}]   ;;  %s2320_s3 = inlined_call_operand.vmem [shape: f32[8,32], index: 3, kind: input, shape index: {}]   ;;  %s2321_s4 = inlined_call_operand.vmem [shape: f32[512,32], index: 4, kind: output, shape index: {0}]   ;;  %s2322_s5 = inlined_call_operand.hbm [shape: f32[1,2,32], index: 5, kind: output, shape index: {1}]  }
   0x1   :  { %v284_v0 = vld [vmem:[%s2320_s3] sm:$0xff]  ;;  %v21_v4 = vld [vmem:[%s2317_s0 + $0x8] sm:$0xff] }
   0x2   :  { %v20_v1 = vld [vmem:[%s2317_s0] sm:$0xff]  ;;  %493 = vmatpush.msra.mxu0 %v284_v0  ;;  %1170 = vmatpush.msra.mxu1 %v284_v0 }
   0x3   :  { %v1242_v2 = vld [vmem:[%s2318_s1] ss:$0 sm:$0xff]  ;;  %1171 = vmatpush.msra.mxu2 %v284_v0  ;;  %1172 = vmatpush.msra.mxu3 %v284_v0 }
   0x4   :  { %v1247_v3 = vld [vmem:[%s2319_s2] ss:$0 sm:$0xff]  ;;  %v88_v5 = vmul.f32 %v1242_v2, %v20_v1 }
   0x5   :  { %v36_v6 = vld [vmem:[%s2317_s0 + $0x80] sm:$0xff] }
   0x6   :  { %11 = vsyncpa [#allocation3], 0  ;;  %v104_v7 = vmul.f32 %v1242_v2, %v36_v6  ;;  %v156_v8 = vadd.f32 %v1247_v3, %v88_v5  ;;  %v89_v9 = vmul.f32 %v1242_v2, %v21_v4  ;;  %vm285_vm0 = vcmask 64512   ;;  %v22_v14 = vld [vmem:[%s2317_s0 + $0x10] sm:$0xff]  ;;  %v37_v15 = vld [vmem:[%s2317_s0 + $0x88] sm:$0xff]  ;;  %s1095_s27 = sshll.u32 %s2322_s5, 4  ;;  %s1096_s27 = int_to_ptr.hbm [resolvable:$true] %s1095_s27 }
   0x7   :  { %v105_v16 = vmul.f32 %v1242_v2, %v37_v15  ;;  %v90_v18 = vmul.f32 %v1242_v2, %v22_v14  ;;  %v23_v22 = vld [vmem:[%s2317_s0 + $0x18] sm:$0xff]  ;;  %v38_v23 = vld [vmem:[%s2317_s0 + $0x90] sm:$0xff]  ;;  %v24_v30 = vld [vmem:[%s2317_s0 + $0x20] sm:$0xff]  ;;  %vm687_vm1 = vcmask 261120   ;;  %vm1082_vm2 = vcmask 1040384  }
   0x8   :  { %v172_v10 = vadd.f32 %v1247_v3, %v104_v7  ;;  %v220_v11 = vmax.f32 %v156_v8, 0.0  ;;  %v157_v13 = vadd.f32 %v1247_v3, %v89_v9  ;;  %v106_v24 = vmul.f32 %v1242_v2, %v38_v23  ;;  %v39_v31 = vld [vmem:[%s2317_s0 + $0x98] sm:$0xff]  ;;  %v52_v33 = vld [vmem:[%s2317_s0 + $0x100] sm:$0xff]  ;;  %v25_v42 = vld [vmem:[%s2317_s0 + $0x28] sm:$0xff] }
   0x9   :  { %v173_v19 = vadd.f32 %v1247_v3, %v105_v16  ;;  %v158_v21 = vadd.f32 %v1247_v3, %v90_v18  ;;  %v91_v26 = vmul.f32 %v1242_v2, %v23_v22  ;;  %v107_v32 = vmul.f32 %v1242_v2, %v39_v31  ;;  %v40_v43 = vld [vmem:[%s2317_s0 + $0xa0] sm:$0xff]  ;;  %v53_v45 = vld [vmem:[%s2317_s0 + $0x108] sm:$0xff]  ;;  %v26_v54 = vld [vmem:[%s2317_s0 + $0x30] sm:$0xff] }
   0xa   :  { %v236_v12 = vmax.f32 %v172_v10, 0.0  ;;  %1106 = vmatmul.msk.f32.vlgmr.msra.gmra.mxu0 %vm285_vm0, %v220_v11  ;;  %v221_v17 = vmax.f32 %v157_v13, 0.0  ;;  %v174_v27 = vadd.f32 %v1247_v3, %v106_v24  ;;  %v92_v35 = vmul.f32 %v1242_v2, %v24_v30  ;;  %v41_v55 = vld [vmem:[%s2317_s0 + $0xa8] sm:$0xff]  ;;  %v54_v57 = vld [vmem:[%s2317_s0 + $0x110] sm:$0xff]  ;;  %v27_v4 = vld [vmem:[%s2317_s0 + $0x38] sm:$0xff] }
   0xb   :  { %v237_v20 = vmax.f32 %v173_v19, 0.0  ;;  %v222_v25 = vmax.f32 %v158_v21, 0.0  ;;  %v159_v29 = vadd.f32 %v1247_v3, %v91_v26  ;;  %v175_v36 = vadd.f32 %v1247_v3, %v107_v32  ;;  %v42_v5 = vld [vmem:[%s2317_s0 + $0xb0] sm:$0xff]  ;;  %v55_v7 = vld [vmem:[%s2317_s0 + $0x118] sm:$0xff]  ;;  %v28_v15 = vld [vmem:[%s2317_s0 + $0x40] sm:$0xff] }
   0xc   :  { %1122 = vmatmul.msk.f32.vlgmr.msra.gmra.mxu1 %vm285_vm0, %v236_v12  ;;  %v238_v28 = vmax.f32 %v174_v27, 0.0  ;;  %v120_v37 = vmul.f32 %v1242_v2, %v52_v33  ;;  %v160_v40 = vadd.f32 %v1247_v3, %v92_v35  ;;  %v108_v44 = vmul.f32 %v1242_v2, %v40_v43  ;;  %v68_v21 = vld [vmem:[%s2317_s0 + $0x180] sm:$0xff]  ;;  %v29_v32 = vld [vmem:[%s2317_s0 + $0x48] sm:$0xff] }
   0xd   :  { %v223_v34 = vmax.f32 %v159_v29, 0.0  ;;  %v239_v38 = vmax.f32 %v175_v36, 0.0  ;;  %v93_v47 = vmul.f32 %v1242_v2, %v25_v42  ;;  %v121_v49 = vmul.f32 %v1242_v2, %v53_v45  ;;  %v44_v33 = vld [vmem:[%s2317_s0 + $0xc0] sm:$0xff]  ;;  %v57_v36 = vld [vmem:[%s2317_s0 + $0x128] sm:$0xff] }
   0xe   :  { %v188_v39 = vadd.f32 %v1247_v3, %v120_v37  ;;  %v224_v46 = vmax.f32 %v160_v40, 0.0  ;;  %v176_v48 = vadd.f32 %v1247_v3, %v108_v44  ;;  %v109_v56 = vmul.f32 %v1242_v2, %v41_v55  ;;  %v69_v37 = vld [vmem:[%s2317_s0 + $0x188] sm:$0xff] }
   0xf   :  { %v189_v51 = vadd.f32 %v1247_v3, %v121_v49  ;;  %v161_v52 = vadd.f32 %v1247_v3, %v93_v47  ;;  %v94_v59 = vmul.f32 %v1242_v2, %v26_v54  ;;  %v122_v61 = vmul.f32 %v1242_v2, %v54_v57  ;;  %v45_v49 = vld [vmem:[%s2317_s0 + $0xc8] sm:$0xff] }
  0x10   :  { %v252_v41 = vmax.f32 %v188_v39, 0.0  ;;  %v240_v50 = vmax.f32 %v176_v48, 0.0  ;;  %v177_v60 = vadd.f32 %v1247_v3, %v109_v56  ;;  %v110_v6 = vmul.f32 %v1242_v2, %v42_v5 }
  0x11   :  { %v253_v53 = vmax.f32 %v189_v51, 0.0  ;;  %v225_v58 = vmax.f32 %v161_v52, 0.0  ;;  %v190_v63 = vadd.f32 %v1247_v3, %v122_v61  ;;  %v162_v0 = vadd.f32 %v1247_v3, %v94_v59  ;;  %v58_v52 = vld [vmem:[%s2317_s0 + $0x130] sm:$0xff] }
  0x12   :  { %1107 = vmatmul.msk.f32.gmra.mxu0 %vm285_vm0, %v221_v17  ;;  %1138 = vmatmul.msk.f32.vlgmr.msra.gmra.mxu2 %vm285_vm0, %v252_v41  ;;  %v241_v62 = vmax.f32 %v177_v60, 0.0  ;;  %v95_v9 = vmul.f32 %v1242_v2, %v27_v4  ;;  %v178_v10 = vadd.f32 %v1247_v3, %v110_v6  ;;  %v123_v11 = vmul.f32 %v1242_v2, %v55_v7  ;;  %v43_v17 = vld [vmem:[%s2317_s0 + $0xb8] sm:$0xff] }
  0x13   :  { %v254_v1 = vmax.f32 %v190_v63, 0.0  ;;  %v226_v8 = vmax.f32 %v162_v0, 0.0  ;;  %v111_v18 = vmul.f32 %v1242_v2, %v43_v17  ;;  %v96_v19 = vmul.f32 %v1242_v2, %v28_v15  ;;  %v31_v0 = vld [vmem:[%s2317_s0 + $0x58] sm:$0xff] }
  0x14   :  { %1123 = vmatmul.msk.f32.gmra.mxu1 %vm285_vm0, %v237_v20  ;;  %v242_v12 = vmax.f32 %v178_v10, 0.0  ;;  %v191_v13 = vadd.f32 %v1247_v3, %v123_v11  ;;  %v163_v14 = vadd.f32 %v1247_v3, %v95_v9  ;;  %v56_v20 = vld [vmem:[%s2317_s0 + $0x120] sm:$0xff]  ;;  %v125_v40 = vmul.f32 %v1242_v2, %v57_v36  ;;  %v59_v6 = vld [vmem:[%s2317_s0 + $0x138] sm:$0xff] }
  0x15   :  { %v179_v23 = vadd.f32 %v1247_v3, %v111_v18  ;;  %v124_v24 = vmul.f32 %v1242_v2, %v56_v20  ;;  %v164_v29 = vadd.f32 %v1247_v3, %v96_v19  ;;  %v137_v41 = vmul.f32 %v1242_v2, %v69_v37  ;;  %v71_v7 = vld [vmem:[%s2317_s0 + $0x198] sm:$0xff] }
  0x16   :  { %v255_v16 = vmax.f32 %v191_v13, 0.0  ;;  %v227_v22 = vmax.f32 %v163_v14, 0.0  ;;  %v193_v43 = vadd.f32 %v1247_v3, %v125_v40  ;;  %v126_v56 = vmul.f32 %v1242_v2, %v58_v52  ;;  %v47_v19 = vld [vmem:[%s2317_s0 + $0xd8] sm:$0xff] }
  0x17   :  { %v243_v26 = vmax.f32 %v179_v23, 0.0  ;;  %v192_v27 = vadd.f32 %v1247_v3, %v124_v24  ;;  %v228_v35 = vmax.f32 %v164_v29, 0.0  ;;  %v205_v44 = vadd.f32 %v1247_v3, %v137_v41  ;;  %v72_v23 = vld [vmem:[%s2317_s0 + $0x1a0] sm:$0xff] }
  0x18   :  { %v257_v47 = vmax.f32 %v193_v43, 0.0  ;;  %v194_v59 = vadd.f32 %v1247_v3, %v126_v56  ;;  %v127_v10 = vmul.f32 %v1242_v2, %v59_v6  ;;  %v139_v11 = vmul.f32 %v1242_v2, %v71_v7 }
  0x19   :  { %v256_v30 = vmax.f32 %v192_v27, 0.0  ;;  %v269_v48 = vmax.f32 %v205_v44, 0.0  ;;  %v115_v20 = vmul.f32 %v1242_v2, %v47_v19  ;;  %v140_v27 = vmul.f32 %v1242_v2, %v72_v23  ;;  %v76_v23 = vld [vmem:[%s2317_s0 + $0x1c0] sm:$0xff] }
  0x1a   :  { %1108 = vmatmul.msk.f32.gmra.mxu0 %vm285_vm0, %v222_v25  ;;  %1139 = vmatmul.msk.f32.gmra.mxu2 %vm285_vm0, %v253_v53  ;;  %v136_v25 = vmul.f32 %v1242_v2, %v68_v21  ;;  %v70_v53 = vld [vmem:[%s2317_s0 + $0x190] sm:$0xff]  ;;  %v195_v13 = vadd.f32 %v1247_v3, %v127_v10  ;;  %v207_v14 = vadd.f32 %v1247_v3, %v139_v11  ;;  %vm1084_vm3 = vcmask 254976  }
  0x1b   :  { %v138_v57 = vmul.f32 %v1242_v2, %v70_v53 }
  0x1c   :  { %1124 = vmatmul.msk.f32.gmra.mxu1 %vm285_vm0, %v238_v28  ;;  %v204_v28 = vadd.f32 %v1247_v3, %v136_v25  ;;  %v259_v17 = vmax.f32 %v195_v13, 0.0  ;;  %v271_v18 = vmax.f32 %v207_v14, 0.0  ;;  %v183_v25 = vadd.f32 %v1247_v3, %v115_v20  ;;  %v51_v20 = vld [vmem:[%s2317_s0 + $0xf8] sm:$0xff] }
  0x1d   :  { %v206_v60 = vadd.f32 %v1247_v3, %v138_v57 }
  0x1e   :  { %v268_v31 = vmax.f32 %v204_v28, 0.0  ;;  %v247_v28 = vmax.f32 %v183_v25, 0.0 }
  0x1f   :  { %v270_v63 = vmax.f32 %v206_v60, 0.0 }
  0x20   :  { %1154 = vmatmul.msk.f32.vlgmr.msra.gmra.mxu3 %vm285_vm0, %v268_v31 }
  0x22   :  { %1109 = vmatmul.msk.f32.gmra.mxu0 %vm285_vm0, %v223_v34  ;;  %1140 = vmatmul.msk.f32.gmra.mxu2 %vm285_vm0, %v254_v1  ;;  %v112_v34 = vmul.f32 %v1242_v2, %v44_v33  ;;  %v46_v1 = vld [vmem:[%s2317_s0 + $0xd0] sm:$0xff] }
  0x23   :  { %v114_v4 = vmul.f32 %v1242_v2, %v46_v1 }
  0x24   :  { %1125 = vmatmul.msk.f32.gmra.mxu1 %vm285_vm0, %v239_v38  ;;  %v97_v38 = vmul.f32 %v1242_v2, %v29_v32  ;;  %v180_v39 = vadd.f32 %v1247_v3, %v112_v34  ;;  %v33_v34 = vld [vmem:[%s2317_s0 + $0x68] sm:$0xff] }
  0x25   :  { %v182_v9 = vadd.f32 %v1247_v3, %v114_v4  ;;  %v101_v40 = vmul.f32 %v1242_v2, %v33_v34  ;;  %v35_v4 = vld [vmem:[%s2317_s0 + $0x78] sm:$0xff]  ;;  %v77_v34 = vld [vmem:[%s2317_s0 + $0x1c8] sm:$0xff] }
  0x26   :  { %v244_v42 = vmax.f32 %v180_v39, 0.0  ;;  %v165_v45 = vadd.f32 %v1247_v3, %v97_v38  ;;  %v61_v38 = vld [vmem:[%s2317_s0 + $0x148] sm:$0xff]  ;;  %v103_v10 = vmul.f32 %v1242_v2, %v35_v4 }
  0x27   :  { %v73_v39 = vld [vmem:[%s2317_s0 + $0x1a8] sm:$0xff] }
  0x28   :  { %1155 = vmatmul.msk.f32.gmra.mxu3 %vm285_vm0, %v269_v48  ;;  %v229_v54 = vmax.f32 %v165_v45, 0.0  ;;  %v141_v43 = vmul.f32 %v1242_v2, %v73_v39  ;;  %v34_v48 = vld [vmem:[%s2317_s0 + $0x70] sm:$0xff] }
  0x29   :  { %v102_v53 = vmul.f32 %v1242_v2, %v34_v48 }
  0x2a   :  { %1110 = vmatmul.msk.f32.gmra.mxu0 %vm285_vm0, %v224_v46  ;;  %1141 = vmatmul.msk.f32.gmra.mxu2 %vm285_vm0, %v255_v16  ;;  %v30_v46 = vld [vmem:[%s2317_s0 + $0x50] sm:$0xff]  ;;  %v32_v16 = vld [vmem:[%s2317_s0 + $0x60] sm:$0xff] }
  0x2b   :  { %v98_v51 = vmul.f32 %v1242_v2, %v30_v46  ;;  %v100_v21 = vmul.f32 %v1242_v2, %v32_v16  ;;  %v209_v46 = vadd.f32 %v1247_v3, %v141_v43  ;;  %v66_v43 = vld [vmem:[%s2317_s0 + $0x170] sm:$0xff] }
  0x2c   :  { %1126 = vmatmul.msk.f32.gmra.mxu1 %vm285_vm0, %v240_v50  ;;  %v113_v50 = vmul.f32 %v1242_v2, %v45_v49 }
  0x2d   :  { %v166_v61 = vadd.f32 %v1247_v3, %v98_v51  ;;  %v168_v31 = vadd.f32 %v1247_v3, %v100_v21  ;;  %v49_v51 = vld [vmem:[%s2317_s0 + $0xe8] sm:$0xff]  ;;  %v119_v21 = vmul.f32 %v1242_v2, %v51_v20 }
  0x2e   :  { %v181_v55 = vadd.f32 %v1247_v3, %v113_v50  ;;  %v273_v50 = vmax.f32 %v209_v46, 0.0  ;;  %v117_v52 = vmul.f32 %v1242_v2, %v49_v51  ;;  %v134_v46 = vmul.f32 %v1242_v2, %v66_v43 }
  0x2f   :  { %v230_v5 = vmax.f32 %v166_v61, 0.0  ;;  %v232_v37 = vmax.f32 %v168_v31, 0.0  ;;  %v187_v25 = vadd.f32 %v1247_v3, %v119_v21 }
  0x30   :  { %1156 = vmatmul.msk.f32.gmra.mxu3 %vm285_vm0, %v270_v63  ;;  %v185_v57 = vadd.f32 %v1247_v3, %v117_v52  ;;  %v170_v63 = vadd.f32 %v1247_v3, %v102_v53  ;;  %v202_v53 = vadd.f32 %v1247_v3, %v134_v46 }
  0x32   :  { %1111 = vmatmul.msk.f32.gmra.mxu0 %vm285_vm0, %v225_v58  ;;  %1142 = vmatmul.msk.f32.gmra.mxu2 %vm285_vm0, %v256_v30  ;;  %v245_v58 = vmax.f32 %v181_v55, 0.0  ;;  %v208_v30 = vadd.f32 %v1247_v3, %v140_v27  ;;  %v74_v55 = vld [vmem:[%s2317_s0 + $0x1b0] sm:$0xff]  ;;  %v249_v60 = vmax.f32 %v185_v57, 0.0  ;;  %v234_v7 = vmax.f32 %v170_v63, 0.0 }
  0x33   :  { %v144_v27 = vmul.f32 %v1242_v2, %v76_v23 }
  0x34   :  { %1127 = vmatmul.msk.f32.gmra.mxu1 %vm285_vm0, %v241_v62  ;;  %v258_v62 = vmax.f32 %v194_v59, 0.0  ;;  %v272_v33 = vmax.f32 %v208_v30, 0.0  ;;  %v142_v59 = vmul.f32 %v1242_v2, %v74_v55 }
  0x35   :  { %v212_v30 = vadd.f32 %v1247_v3, %v144_v27 }
  0x38   :  { %1157 = vmatmul.msk.f32.gmra.mxu3 %vm285_vm0, %v271_v18 }
  0x3a   :  { %1112 = vmatmul.msk.f32.gmra.mxu0 %vm285_vm0, %v226_v8  ;;  %1143 = vmatmul.msk.f32.gmra.mxu2 %vm285_vm0, %v257_v47  ;;  %v99_v8 = vmul.f32 %v1242_v2, %v31_v0  ;;  %v169_v47 = vadd.f32 %v1247_v3, %v101_v40 }
  0x3c   :  { %1128 = vmatmul.msk.f32.gmra.mxu1 %vm285_vm0, %v242_v12  ;;  %v246_v12 = vmax.f32 %v182_v9, 0.0  ;;  %v167_v15 = vadd.f32 %v1247_v3, %v99_v8  ;;  %v233_v56 = vmax.f32 %v169_v47, 0.0  ;;  %v63_v8 = vld [vmem:[%s2317_s0 + $0x158] sm:$0xff] }
  0x3d   :  { %v75_v9 = vld [vmem:[%s2317_s0 + $0x1b8] sm:$0xff] }
  0x3e   :  { %v231_v24 = vmax.f32 %v167_v15, 0.0  ;;  %v143_v13 = vmul.f32 %v1242_v2, %v75_v9 }
  0x40   :  { %1158 = vmatmul.msk.f32.gmra.mxu3 %vm285_vm0, %v272_v33  ;;  %v211_v16 = vadd.f32 %v1247_v3, %v143_v13  ;;  %v65_v33 = vld [vmem:[%s2317_s0 + $0x168] sm:$0xff] }
  0x42   :  { %1113 = vmatmul.msk.f32.gmra.mxu0 %vm285_vm0, %v227_v22  ;;  %1144 = vmatmul.msk.f32.gmra.mxu2 %vm285_vm0, %v258_v62  ;;  %v60_v22 = vld [vmem:[%s2317_s0 + $0x140] sm:$0xff]  ;;  %v210_v62 = vadd.f32 %v1247_v3, %v142_v59  ;;  %v275_v19 = vmax.f32 %v211_v16, 0.0 }
  0x44   :  { %1129 = vmatmul.msk.f32.gmra.mxu1 %vm285_vm0, %v243_v26  ;;  %v128_v26 = vmul.f32 %v1242_v2, %v60_v22  ;;  %v274_v1 = vmax.f32 %v210_v62, 0.0  ;;  %v64_v22 = vld [vmem:[%s2317_s0 + $0x160] sm:$0xff]  ;;  %v79_v62 = vld [vmem:[%s2317_s0 + $0x1d8] sm:$0xff] }
  0x46   :  { %v196_v29 = vadd.f32 %v1247_v3, %v128_v26  ;;  %v132_v26 = vmul.f32 %v1242_v2, %v64_v22 }
  0x48   :  { %v260_v32 = vmax.f32 %v196_v29, 0.0  ;;  %1159 = vmatmul.msk.f32.gmra.mxu3 %vm285_vm0, %v273_v50  ;;  %v200_v29 = vadd.f32 %v1247_v3, %v132_v26 }
  0x4a   :  { %1114 = vmatmul.msk.f32.gmra.mxu0 %vm285_vm0, %v228_v35  ;;  %1145 = vmatmul.msk.f32.gmra.mxu2 %vm285_vm0, %v259_v17  ;;  %v48_v35 = vld [vmem:[%s2317_s0 + $0xe0] sm:$0xff]  ;;  %v171_v17 = vadd.f32 %v1247_v3, %v103_v10  ;;  %v264_v31 = vmax.f32 %v200_v29, 0.0 }
  0x4b   :  { %v116_v36 = vmul.f32 %v1242_v2, %v48_v35  ;;  %v133_v35 = vmul.f32 %v1242_v2, %v65_v33 }
  0x4c   :  { %1130 = vmatmul.msk.f32.gmra.mxu1 %vm285_vm0, %v244_v42  ;;  %v129_v42 = vmul.f32 %v1242_v2, %v61_v38 }
  0x4d   :  { %v184_v41 = vadd.f32 %v1247_v3, %v116_v36  ;;  %v145_v36 = vmul.f32 %v1242_v2, %v77_v34  ;;  %v201_v39 = vadd.f32 %v1247_v3, %v133_v35 }
  0x4e   :  { %v197_v45 = vadd.f32 %v1247_v3, %v129_v42 }
  0x4f   :  { %v248_v44 = vmax.f32 %v184_v41, 0.0  ;;  %v213_v40 = vadd.f32 %v1247_v3, %v145_v36  ;;  %v265_v41 = vmax.f32 %v201_v39, 0.0 }
  0x50   :  { %v261_v49 = vmax.f32 %v197_v45, 0.0  ;;  %1160 = vmatmul.msk.f32.gmra.mxu3 %vm285_vm0, %v274_v1 }
  0x51   :  { %v277_v42 = vmax.f32 %v213_v40, 0.0 }
  0x52   :  { %1115 = vmatmul.msk.f32.gmra.mxu0 %vm285_vm0, %v229_v54  ;;  %1146 = vmatmul.msk.f32.gmra.mxu2 %vm285_vm0, %v260_v32  ;;  %v62_v54 = vld [vmem:[%s2317_s0 + $0x150] sm:$0xff]  ;;  %v276_v32 = vmax.f32 %v212_v30, 0.0 }
  0x54   :  { %1131 = vmatmul.msk.f32.gmra.mxu1 %vm285_vm0, %v245_v58  ;;  %v130_v58 = vmul.f32 %v1242_v2, %v62_v54 }
  0x56   :  { %v198_v61 = vadd.f32 %v1247_v3, %v130_v58  ;;  %v266_v58 = vmax.f32 %v202_v53, 0.0 }
  0x58   :  { %v262_v0 = vmax.f32 %v198_v61, 0.0  ;;  %1161 = vmatmul.msk.f32.gmra.mxu3 %vm285_vm0, %v275_v19  ;;  %v67_v61 = vld [vmem:[%s2317_s0 + $0x178] sm:$0xff] }
  0x59   :  { %v135_v63 = vmul.f32 %v1242_v2, %v67_v61 }
  0x5a   :  { %1116 = vmatmul.msk.f32.gmra.mxu0 %vm285_vm0, %v230_v5  ;;  %1147 = vmatmul.msk.f32.gmra.mxu2 %vm285_vm0, %v261_v49  ;;  %v50_v5 = vld [vmem:[%s2317_s0 + $0xf0] sm:$0xff] }
  0x5b   :  { %v118_v6 = vmul.f32 %v1242_v2, %v50_v5 }
  0x5c   :  { %1132 = vmatmul.msk.f32.gmra.mxu1 %vm285_vm0, %v246_v12  ;;  %v131_v12 = vmul.f32 %v1242_v2, %v63_v8 }
  0x5d   :  { %v186_v11 = vadd.f32 %v1247_v3, %v118_v6 }
  0x5e   :  { %v199_v15 = vadd.f32 %v1247_v3, %v131_v12 }
  0x5f   :  { %v250_v14 = vmax.f32 %v186_v11, 0.0 }
  0x60   :  { %v263_v18 = vmax.f32 %v199_v15, 0.0  ;;  %1162 = vmatmul.msk.f32.gmra.mxu3 %vm285_vm0, %v276_v32 }
  0x62   :  { %1117 = vmatmul.msk.f32.gmra.mxu0 %vm285_vm0, %v231_v24  ;;  %1148 = vmatmul.msk.f32.gmra.mxu2 %vm285_vm0, %v262_v0  ;;  %v235_v24 = vmax.f32 %v171_v17, 0.0  ;;  %v147_v0 = vmul.f32 %v1242_v2, %v79_v62 }
  0x64   :  { %1133 = vmatmul.msk.f32.gmra.mxu1 %vm285_vm0, %v247_v28  ;;  %v251_v28 = vmax.f32 %v187_v25, 0.0  ;;  %v215_v8 = vadd.f32 %v1247_v3, %v147_v0  ;;  %v81_v25 = vld [vmem:[%s2317_s0 + $0x1e8] sm:$0xff] }
  0x65   :  { %v149_v26 = vmul.f32 %v1242_v2, %v81_v25 }
  0x66   :  { %v279_v12 = vmax.f32 %v215_v8, 0.0 }
  0x67   :  { %v217_v33 = vadd.f32 %v1247_v3, %v149_v26 }
  0x68   :  { %1163 = vmatmul.msk.f32.gmra.mxu3 %vm285_vm0, %v277_v42 }
  0x69   :  { %v281_v36 = vmax.f32 %v217_v33, 0.0 }
  0x6a   :  { %1118 = vmatmul.msk.f32.gmra.mxu0 %vm285_vm0, %v232_v37  ;;  %1149 = vmatmul.msk.f32.gmra.mxu2 %vm285_vm0, %v263_v18 }
  0x6c   :  { %1134 = vmatmul.msk.f32.gmra.mxu1 %vm285_vm0, %v248_v44  ;;  %v78_v44 = vld [vmem:[%s2317_s0 + $0x1d0] sm:$0xff] }
  0x6d   :  { %v146_v47 = vmul.f32 %v1242_v2, %v78_v44 }
  0x6f   :  { %v214_v54 = vadd.f32 %v1247_v3, %v146_v47 }
  0x71   :  { %v278_v59 = vmax.f32 %v214_v54, 0.0 }
  0x72   :  { %1119 = vmatmul.msk.f32.gmra.mxu0 %vm285_vm0, %v233_v56  ;;  %1150 = vmatmul.msk.f32.gmra.mxu2 %vm285_vm0, %v264_v31 }
  0x73   :  { %1164 = vmatmul.msk.f32.gmra.mxu3 %vm285_vm0, %v278_v59 }
  0x74   :  { %1135 = vmatmul.msk.f32.gmra.mxu1 %vm285_vm0, %v249_v60 }
  0x7a   :  { %1120 = vmatmul.msk.f32.gmra.mxu0 %vm285_vm0, %v234_v7  ;;  %1151 = vmatmul.msk.f32.gmra.mxu2 %vm285_vm0, %v265_v41  ;;  %v203_v7 = vadd.f32 %v1247_v3, %v135_v63 }
  0x7b   :  { %1165 = vmatmul.msk.f32.gmra.mxu3 %vm285_vm0, %v279_v12 }
  0x7c   :  { %1136 = vmatmul.msk.f32.gmra.mxu1 %vm285_vm0, %v250_v14  ;;  %v267_v11 = vmax.f32 %v203_v7, 0.0  ;;  %v80_v14 = vld [vmem:[%s2317_s0 + $0x1e0] sm:$0xff] }
  0x7d   :  { %v148_v15 = vmul.f32 %v1242_v2, %v80_v14 }
  0x7f   :  { %v216_v20 = vadd.f32 %v1247_v3, %v148_v15 }
  0x81   :  { %v280_v23 = vmax.f32 %v216_v20, 0.0 }
  0x82   :  { %1121 = vmatmul.msk.f32.gmra.mxu0 %vm285_vm0, %v235_v24  ;;  %1152 = vmatmul.msk.f32.gmra.mxu2 %vm285_vm0, %v266_v58 }
  0x83   :  { %1166 = vmatmul.msk.f32.gmra.mxu3 %vm285_vm0, %v280_v23 }
  0x84   :  { %1137 = vmatmul.msk.f32.gmra.mxu1 %vm285_vm0, %v251_v28 }
  0x87   :  { %v495_v37 = vpop.f32.mrf.mxu0 }
  0x88   :  { %688 = vst.msk [vmem:[%s2321_s4] sm:$0xff] %vm687_vm1, %v495_v37  ;;  %v885_v45 = vmul.f32 %v495_v37, %v495_v37  ;;  %v752_v48 = vsel %vm687_vm1, %v495_v37, 0.0  ;;  %v82_v37 = vld [vmem:[%s2317_s0 + $0x1f0] sm:$0xff] }
  0x89   :  { %v1582_v38 = vpop.f32.mrf.mxu1  ;;  %v150_v39 = vmul.f32 %v1242_v2, %v82_v37 }
  0x8a   :  { %704 = vst.msk [vmem:[%s2321_s4 + $0x80] sm:$0xff] %vm687_vm1, %v1582_v38  ;;  %v949_v56 = vsel %vm687_vm1, %v885_v45, 0.0  ;;  %1153 = vmatmul.msk.f32.gmra.mxu2 %vm285_vm0, %v267_v11  ;;  %v83_v45 = vld [vmem:[%s2317_s0 + $0x1f8] sm:$0xff] }
  0x8b   :  { %1167 = vmatmul.msk.f32.gmra.mxu3 %vm285_vm0, %v281_v36  ;;  %v218_v43 = vadd.f32 %v1247_v3, %v150_v39  ;;  %v151_v46 = vmul.f32 %v1242_v2, %v83_v45 }
  0x8d   :  { %v282_v44 = vmax.f32 %v218_v43, 0.0 }
  0x8f   :  { %v498_v49 = vpop.f32.mrf.mxu0 }
  0x90   :  { %689 = vst.msk [vmem:[%s2321_s4 + $0x8] sm:$0xff] %vm687_vm1, %v498_v49  ;;  %v753_v50 = vsel %vm687_vm1, %v498_v49, 0.0  ;;  %v886_v51 = vmul.f32 %v498_v49, %v498_v49 }
  0x91   :  { %v1607_v52 = vpop.f32.mrf.mxu1  ;;  %v754_v55 = vadd.f32 %v753_v50, %v752_v48  ;;  %v219_v50 = vadd.f32 %v1247_v3, %v151_v46 }
  0x92   :  { %705 = vst.msk [vmem:[%s2321_s4 + $0x88] sm:$0xff] %vm687_vm1, %v1607_v52  ;;  %v950_v57 = vsel %vm687_vm1, %v886_v51, 0.0 }
  0x93   :  { %v951_v60 = vadd.f32 %v950_v57, %v949_v56  ;;  %1168 = vmatmul.msk.f32.gmra.mxu3 %vm285_vm0, %v282_v44  ;;  %v283_v2 = vmax.f32 %v219_v50, 0.0 }
  0x95   :  { %v1668_v28 = vpop.f32.mrf.mxu2 }
  0x96   :  { %720 = vst.msk [vmem:[%s2321_s4 + $0x100] sm:$0xff] %vm687_vm1, %v1668_v28 }
  0x97   :  { %v501_v1 = vpop.f32.mrf.mxu0 }
  0x98   :  { %690 = vst.msk [vmem:[%s2321_s4 + $0x10] sm:$0xff] %vm687_vm1, %v501_v1  ;;  %v755_v4 = vsel %vm687_vm1, %v501_v1, 0.0  ;;  %v887_v5 = vmul.f32 %v501_v1, %v501_v1 }
  0x99   :  { %v1633_v6 = vpop.f32.mrf.mxu1  ;;  %v756_v9 = vadd.f32 %v755_v4, %v754_v55 }
  0x9a   :  { %706 = vst.msk [vmem:[%s2321_s4 + $0x90] sm:$0xff] %vm687_vm1, %v1633_v6  ;;  %v952_v10 = vsel %vm687_vm1, %v887_v5, 0.0 }
  0x9b   :  { %v953_v13 = vadd.f32 %v952_v10, %v951_v60  ;;  %1169 = vmatmul.msk.f32.gmra.mxu3 %vm285_vm0, %v283_v2 }
  0x9d   :  { %v1700_v41 = vpop.f32.mrf.mxu2 }
  0x9e   :  { %721 = vst.msk [vmem:[%s2321_s4 + $0x108] sm:$0xff] %vm687_vm1, %v1700_v41 }
  0x9f   :  { %v504_v16 = vpop.f32.mrf.mxu0 }
  0xa0   :  { %691 = vst.msk [vmem:[%s2321_s4 + $0x18] sm:$0xff] %vm687_vm1, %v504_v16  ;;  %v757_v17 = vsel %vm687_vm1, %v504_v16, 0.0  ;;  %v888_v18 = vmul.f32 %v504_v16, %v504_v16 }
  0xa1   :  { %v1654_v19 = vpop.f32.mrf.mxu1  ;;  %v758_v21 = vadd.f32 %v757_v17, %v756_v9 }
  0xa2   :  { %707 = vst.msk [vmem:[%s2321_s4 + $0x98] sm:$0xff] %vm687_vm1, %v1654_v19  ;;  %v954_v22 = vsel %vm687_vm1, %v888_v18, 0.0 }
  0xa3   :  { %v955_v24 = vadd.f32 %v954_v22, %v953_v13  ;;  %v1771_v57 = vpop.f32.mrf.mxu3 }
  0xa4   :  { %736 = vst.msk [vmem:[%s2321_s4 + $0x180] sm:$0xff] %vm687_vm1, %v1771_v57 }
  0xa5   :  { %v1725_v48 = vpop.f32.mrf.mxu2 }
  0xa6   :  { %722 = vst.msk [vmem:[%s2321_s4 + $0x110] sm:$0xff] %vm687_vm1, %v1725_v48 }
  0xa7   :  { %v507_v27 = vpop.f32.mrf.mxu0 }
  0xa8   :  { %692 = vst.msk [vmem:[%s2321_s4 + $0x20] sm:$0xff] %vm687_vm1, %v507_v27  ;;  %v759_v29 = vsel %vm687_vm1, %v507_v27, 0.0  ;;  %v889_v30 = vmul.f32 %v507_v27, %v507_v27 }
  0xa9   :  { %v1675_v31 = vpop.f32.mrf.mxu1  ;;  %v1677_v32 = vadd.f32 %v759_v29, %v758_v21 }
  0xaa   :  { %708 = vst.msk [vmem:[%s2321_s4 + $0xa0] sm:$0xff] %vm687_vm1, %v1675_v31  ;;  %v956_v34 = vsel %vm687_vm1, %v889_v30, 0.0 }
  0xab   :  { %v1691_v35 = vadd.f32 %v956_v34, %v955_v24  ;;  %v1796_v61 = vpop.f32.mrf.mxu3 }
  0xac   :  { %737 = vst.msk [vmem:[%s2321_s4 + $0x188] sm:$0xff] %vm687_vm1, %v1796_v61 }
  0xad   :  { %v1745_v53 = vpop.f32.mrf.mxu2 }
  0xae   :  { %723 = vst.msk [vmem:[%s2321_s4 + $0x118] sm:$0xff] %vm687_vm1, %v1745_v53 }
  0xaf   :  { %v1698_v40 = vpop.f32.mrf.mxu0 }
  0xb0   :  { %693 = vst.msk [vmem:[%s2321_s4 + $0x28] sm:$0xff] %vm687_vm1, %v1698_v40  ;;  %v890_v11 = vmul.f32 %v1698_v40, %v1698_v40  ;;  %v761_v14 = vsel %vm687_vm1, %v1698_v40, 0.0 }
  0xb1   :  { %v1707_v42 = vpop.f32.mrf.mxu1  ;;  %v762_v20 = vadd.f32 %v761_v14, %v1677_v32 }
  0xb2   :  { %709 = vst.msk [vmem:[%s2321_s4 + $0xa8] sm:$0xff] %vm687_vm1, %v1707_v42  ;;  %v958_v16 = vsel %vm687_vm1, %v890_v11, 0.0 }
  0xb3   :  { %v1821_v1 = vpop.f32.mrf.mxu3  ;;  %v959_v24 = vadd.f32 %v958_v16, %v1691_v35 }
  0xb4   :  { %738 = vst.msk [vmem:[%s2321_s4 + $0x190] sm:$0xff] %vm687_vm1, %v1821_v1 }
  0xb5   :  { %v1763_v55 = vpop.f32.mrf.mxu2 }
  0xb6   :  { %724 = vst.msk [vmem:[%s2321_s4 + $0x120] sm:$0xff] %vm687_vm1, %v1763_v55 }
  0xb7   :  { %v513_v47 = vpop.f32.mrf.mxu0 }
  0xb8   :  { %694 = vst.msk [vmem:[%s2321_s4 + $0x30] sm:$0xff] %vm687_vm1, %v513_v47  ;;  %v891_v15 = vmul.f32 %v513_v47, %v513_v47  ;;  %v763_v17 = vsel %vm687_vm1, %v513_v47, 0.0 }
  0xb9   :  { %v1731_v49 = vpop.f32.mrf.mxu1  ;;  %v764_v25 = vadd.f32 %v763_v17, %v762_v20 }
  0xba   :  { %710 = vst.msk [vmem:[%s2321_s4 + $0xb0] sm:$0xff] %vm687_vm1, %v1731_v49  ;;  %v960_v21 = vsel %vm687_vm1, %v891_v15, 0.0 }
  0xbb   :  { %v1846_v8 = vpop.f32.mrf.mxu3  ;;  %v961_v36 = vadd.f32 %v960_v21, %v959_v24 }
  0xbc   :  { %739 = vst.msk [vmem:[%s2321_s4 + $0x198] sm:$0xff] %vm687_vm1, %v1846_v8 }
  0xbd   :  { %v1788_v59 = vpop.f32.mrf.mxu2 }
  0xbe   :  { %725 = vst.msk [vmem:[%s2321_s4 + $0x128] sm:$0xff] %vm687_vm1, %v1788_v59 }
  0xbf   :  { %v516_v51 = vpop.f32.mrf.mxu0 }
  0xc0   :  { %695 = vst.msk [vmem:[%s2321_s4 + $0x38] sm:$0xff] %vm687_vm1, %v516_v51  ;;  %v892_v18 = vmul.f32 %v516_v51, %v516_v51  ;;  %v765_v22 = vsel %vm687_vm1, %v516_v51, 0.0 }
  0xc1   :  { %v1751_v54 = vpop.f32.mrf.mxu1  ;;  %v766_v35 = vadd.f32 %v765_v22, %v764_v25 }
  0xc2   :  { %711 = vst.msk [vmem:[%s2321_s4 + $0xb8] sm:$0xff] %vm687_vm1, %v1751_v54  ;;  %v962_v29 = vsel %vm687_vm1, %v892_v18, 0.0 }
  0xc3   :  { %v1873_v13 = vpop.f32.mrf.mxu3  ;;  %v963_v43 = vadd.f32 %v962_v29, %v961_v36 }
  0xc4   :  { %740 = vst.msk [vmem:[%s2321_s4 + $0x1a0] sm:$0xff] %vm687_vm1, %v1873_v13 }
  0xc5   :  { %v1813_v63 = vpop.f32.mrf.mxu2 }
  0xc6   :  { %726 = vst.msk [vmem:[%s2321_s4 + $0x130] sm:$0xff] %vm687_vm1, %v1813_v63 }
  0xc7   :  { %v519_v3 = vpop.f32.mrf.mxu0 }
  0xc8   :  { %696 = vst.msk [vmem:[%s2321_s4 + $0x40] sm:$0xff] %vm687_vm1, %v519_v3  ;;  %v893_v23 = vmul.f32 %v519_v3, %v519_v3  ;;  %v767_v30 = vsel %vm687_vm1, %v519_v3, 0.0 }
  0xc9   :  { %v1769_v56 = vpop.f32.mrf.mxu1  ;;  %v768_v44 = vadd.f32 %v767_v30, %v766_v35 }
  0xca   :  { %712 = vst.msk [vmem:[%s2321_s4 + $0xc0] sm:$0xff] %vm687_vm1, %v1769_v56  ;;  %v964_v37 = vsel %vm687_vm1, %v893_v23, 0.0 }
  0xcb   :  { %v1908_v34 = vpop.f32.mrf.mxu3  ;;  %v965_v50 = vadd.f32 %v964_v37, %v963_v43 }
  0xcc   :  { %741 = vst.msk [vmem:[%s2321_s4 + $0x1a8] sm:$0xff] %vm687_vm1, %v1908_v34 }
  0xcd   :  { %v1838_v5 = vpop.f32.mrf.mxu2 }
  0xce   :  { %727 = vst.msk [vmem:[%s2321_s4 + $0x138] sm:$0xff] %vm687_vm1, %v1838_v5 }
  0xcf   :  { %v522_v58 = vpop.f32.mrf.mxu0 }
  0xd0   :  { %697 = vst.msk [vmem:[%s2321_s4 + $0x48] sm:$0xff] %vm687_vm1, %v522_v58  ;;  %v894_v33 = vmul.f32 %v522_v58, %v522_v58  ;;  %v769_v39 = vsel %vm687_vm1, %v522_v58, 0.0 }
  0xd1   :  { %v1794_v60 = vpop.f32.mrf.mxu1  ;;  %v770_v2 = vadd.f32 %v769_v39, %v768_v44  ;;  %v901_v44 = vmul.f32 %v1582_v38, %v1582_v38 }
  0xd2   :  { %713 = vst.msk [vmem:[%s2321_s4 + $0xc8] sm:$0xff] %vm687_vm1, %v1794_v60  ;;  %v966_v45 = vsel %vm687_vm1, %v894_v33, 0.0 }
  0xd3   :  { %v967_v11 = vadd.f32 %v966_v45, %v965_v50  ;;  %v1941_v21 = vpop.f32.mrf.mxu3 }
  0xd4   :  { %742 = vst.msk [vmem:[%s2321_s4 + $0x1b0] sm:$0xff] %vm687_vm1, %v1941_v21 }
  0xd5   :  { %v1863_v10 = vpop.f32.mrf.mxu2 }
  0xd6   :  { %728 = vst.msk [vmem:[%s2321_s4 + $0x140] sm:$0xff] %vm687_vm1, %v1863_v10 }
  0xd7   :  { %v525_v62 = vpop.f32.mrf.mxu0 }
  0xd8   :  { %698 = vst.msk [vmem:[%s2321_s4 + $0x50] sm:$0xff] %vm687_vm1, %v525_v62  ;;  %v895_v40 = vmul.f32 %v525_v62, %v525_v62  ;;  %v771_v46 = vsel %vm687_vm1, %v525_v62, 0.0 }
  0xd9   :  { %v1819_v0 = vpop.f32.mrf.mxu1  ;;  %v772_v14 = vadd.f32 %v771_v46, %v770_v2 }
  0xda   :  { %714 = vst.msk [vmem:[%s2321_s4 + $0xd0] sm:$0xff] %vm687_vm1, %v1819_v0  ;;  %v968_v51 = vsel %vm687_vm1, %v895_v40, 0.0 }
  0xdb   :  { %v1974_v50 = vpop.f32.mrf.mxu3 }
  0xdc   :  { %743 = vst.msk [vmem:[%s2321_s4 + $0x1b8] sm:$0xff] %vm687_vm1, %v1974_v50 }
  0xdd   :  { %v1898_v27 = vpop.f32.mrf.mxu2 }
  0xde   :  { %729 = vst.msk [vmem:[%s2321_s4 + $0x148] sm:$0xff] %vm687_vm1, %v1898_v27 }
  0xdf   :  { %v528_v4 = vpop.f32.mrf.mxu0 }
  0xe0   :  { %699 = vst.msk [vmem:[%s2321_s4 + $0x58] sm:$0xff] %vm687_vm1, %v528_v4  ;;  %v896_v47 = vmul.f32 %v528_v4, %v528_v4  ;;  %v773_v3 = vsel %vm687_vm1, %v528_v4, 0.0  ;;  %v969_v4 = vadd.f32 %v968_v51, %v967_v11 }
  0xe1   :  { %v1844_v7 = vpop.f32.mrf.mxu1  ;;  %v774_v22 = vadd.f32 %v773_v3, %v772_v14  ;;  %v783_v3 = vsel %vm687_vm1, %v1582_v38, 0.0  ;;  %v980_v38 = vsel %vm687_vm1, %v901_v44, 0.0 }
  0xe2   :  { %715 = vst.msk [vmem:[%s2321_s4 + $0xd8] sm:$0xff] %vm687_vm1, %v1844_v7  ;;  %v970_v17 = vsel %vm687_vm1, %v896_v47, 0.0 }
  0xe3   :  { %v971_v25 = vadd.f32 %v970_v17, %v969_v4  ;;  %v785_v17 = vsel %vm687_vm1, %v1607_v52, 0.0 }
  0xe5   :  { %v1931_v16 = vpop.f32.mrf.mxu2 }
  0xe6   :  { %730 = vst.msk [vmem:[%s2321_s4 + $0x150] sm:$0xff] %vm687_vm1, %v1931_v16 }
  0xe7   :  { %v531_v9 = vpop.f32.mrf.mxu0 }
  0xe8   :  { %700 = vst.msk [vmem:[%s2321_s4 + $0x60] sm:$0xff] %vm687_vm1, %v531_v9  ;;  %v897_v58 = vmul.f32 %v531_v9, %v531_v9  ;;  %v775_v18 = vsel %vm687_vm1, %v531_v9, 0.0 }
  0xe9   :  { %v1871_v12 = vpop.f32.mrf.mxu1  ;;  %v776_v29 = vadd.f32 %v775_v18, %v774_v22  ;;  %v903_v18 = vmul.f32 %v1633_v6, %v1633_v6 }
  0xea   :  { %716 = vst.msk [vmem:[%s2321_s4 + $0xe0] sm:$0xff] %vm687_vm1, %v1871_v12  ;;  %v972_v9 = vsel %vm687_vm1, %v897_v58, 0.0  ;;  %v902_v58 = vmul.f32 %v1607_v52, %v1607_v52  ;;  %v789_v52 = vsel %vm687_vm1, %v1654_v19, 0.0 }
  0xec   :  { %v982_v22 = vsel %vm687_vm1, %v902_v58, 0.0  ;;  %v908_v58 = vmul.f32 %v1751_v54, %v1751_v54 }
  0xed   :  { %v1963_v43 = vpop.f32.mrf.mxu2 }
  0xee   :  { %731 = vst.msk [vmem:[%s2321_s4 + $0x158] sm:$0xff] %vm687_vm1, %v1963_v43 }
  0xef   :  { %v534_v26 = vpop.f32.mrf.mxu0 }
  0xf0   :  { %701 = vst.msk [vmem:[%s2321_s4 + $0x68] sm:$0xff] %vm687_vm1, %v534_v26  ;;  %v898_v20 = vmul.f32 %v534_v26, %v534_v26  ;;  %v777_v23 = vsel %vm687_vm1, %v534_v26, 0.0  ;;  %v973_v26 = vadd.f32 %v972_v9, %v971_v25  ;;  %v787_v9 = vsel %vm687_vm1, %v1633_v6, 0.0  ;;  %v2018_v6 = vpop.f32.mrf.mxu3 }
  0xf1   :  { %v1906_v32 = vpop.f32.mrf.mxu1  ;;  %v778_v36 = vadd.f32 %v777_v23, %v776_v29  ;;  %v904_v23 = vmul.f32 %v1654_v19, %v1654_v19  ;;  %744 = vst.msk [vmem:[%s2321_s4 + $0x1c0] sm:$0xff] %vm687_vm1, %v2018_v6 }
  0xf2   :  { %717 = vst.msk [vmem:[%s2321_s4 + $0xe8] sm:$0xff] %vm687_vm1, %v1906_v32  ;;  %v974_v30 = vsel %vm687_vm1, %v898_v20, 0.0 }
  0xf3   :  { %v975_v37 = vadd.f32 %v974_v30, %v973_v26  ;;  %v984_v30 = vsel %vm687_vm1, %v903_v18, 0.0  ;;  %v986_v19 = vsel %vm687_vm1, %v904_v23, 0.0 }
  0xf5   :  { %v2006_v29 = vpop.f32.mrf.mxu2 }
  0xf6   :  { %732 = vst.msk [vmem:[%s2321_s4 + $0x160] sm:$0xff] %vm687_vm1, %v2006_v29 }
  0xf7   :  { %v537_v15 = vpop.f32.mrf.mxu0 }
  0xf8   :  { %702 = vst.msk [vmem:[%s2321_s4 + $0x70] sm:$0xff] %vm687_vm1, %v537_v15  ;;  %v899_v24 = vmul.f32 %v537_v15, %v537_v15  ;;  %v779_v33 = vsel %vm687_vm1, %v537_v15, 0.0 }
  0xf9   :  { %v1939_v62 = vpop.f32.mrf.mxu1  ;;  %v780_v39 = vadd.f32 %v779_v33, %v778_v36  ;;  %v905_v33 = vmul.f32 %v1675_v31, %v1675_v31 }
  0xfa   :  { %718 = vst.msk [vmem:[%s2321_s4 + $0xf0] sm:$0xff] %vm687_vm1, %v1939_v62  ;;  %v976_v35 = vsel %vm687_vm1, %v899_v24, 0.0 }
  0xfb   :  { %v977_v2 = vadd.f32 %v976_v35, %v975_v37  ;;  %v791_v35 = vsel %vm687_vm1, %v1675_v31, 0.0  ;;  %v906_v37 = vmul.f32 %v1707_v42, %v1707_v42  ;;  %v988_v44 = vsel %vm687_vm1, %v905_v33, 0.0 }
  0xfc   :  { %v795_v31 = vsel %vm687_vm1, %v1731_v49, 0.0 }
  0xff   :  { %v540_v40 = vpop.f32.mrf.mxu0 }
 0x100   :  { %703 = vst.msk [vmem:[%s2321_s4 + $0x78] sm:$0xff] %vm687_vm1, %v540_v40  ;;  %v781_v45 = vsel %vm687_vm1, %v540_v40, 0.0  ;;  %v900_v46 = vmul.f32 %v540_v40, %v540_v40 }
 0x101   :  { %v1972_v47 = vpop.f32.mrf.mxu1  ;;  %v782_v51 = vadd.f32 %v781_v45, %v780_v39  ;;  %v793_v45 = vsel %vm687_vm1, %v1707_v42, 0.0  ;;  %v797_v42 = vsel %vm687_vm1, %v1751_v54, 0.0  ;;  %v994_v54 = vsel %vm687_vm1, %v908_v58, 0.0 }
 0x102   :  { %719 = vst.msk [vmem:[%s2321_s4 + $0xf8] sm:$0xff] %vm687_vm1, %v1972_v47  ;;  %v978_v11 = vsel %vm687_vm1, %v900_v46, 0.0  ;;  %v907_v46 = vmul.f32 %v1731_v49, %v1731_v49  ;;  %v2052_v49 = vpop.f32.mrf.mxu3  ;;  %v809_v58 = vsel %vm687_vm1, %v1906_v32, 0.0 }
 0x103   :  { %v784_v14 = vadd.f32 %v783_v3, %v782_v51  ;;  %v979_v15 = vadd.f32 %v978_v11, %v977_v2  ;;  %v990_v3 = vsel %vm687_vm1, %v906_v37, 0.0  ;;  %745 = vst.msk [vmem:[%s2321_s4 + $0x1c8] sm:$0xff] %vm687_vm1, %v2052_v49 }
 0x105   :  { %v786_v20 = vadd.f32 %v785_v17, %v784_v14  ;;  %v981_v4 = vadd.f32 %v980_v38, %v979_v15  ;;  %v2040_v15 = vpop.f32.mrf.mxu2  ;;  %v992_v38 = vsel %vm687_vm1, %v907_v46, 0.0  ;;  %v909_v17 = vmul.f32 %v1769_v56, %v1769_v56 }
 0x106   :  { %733 = vst.msk [vmem:[%s2321_s4 + $0x168] sm:$0xff] %vm687_vm1, %v2040_v15  ;;  %v807_v46 = vsel %vm687_vm1, %v1871_v12, 0.0 }
 0x107   :  { %v788_v24 = vadd.f32 %v787_v9, %v786_v20  ;;  %v983_v25 = vadd.f32 %v982_v22, %v981_v4  ;;  %v799_v4 = vsel %vm687_vm1, %v1769_v56, 0.0  ;;  %v910_v22 = vmul.f32 %v1794_v60, %v1794_v60 }
 0x108   :  { %v803_v56 = vsel %vm687_vm1, %v1819_v0, 0.0 }
 0x109   :  { %v790_v26 = vadd.f32 %v789_v52, %v788_v24  ;;  %v985_v36 = vadd.f32 %v984_v30, %v983_v25  ;;  %v996_v24 = vsel %vm687_vm1, %v909_v17, 0.0  ;;  %v801_v25 = vsel %vm687_vm1, %v1794_v60, 0.0 }
 0x10a   :  { %v911_v30 = vmul.f32 %v1819_v0, %v1819_v0  ;;  %v805_v60 = vsel %vm687_vm1, %v1844_v7, 0.0  ;;  %v2086_v0 = vpop.f32.mrf.mxu3  ;;  %v811_v17 = vsel %vm687_vm1, %v1939_v62, 0.0 }
 0x10b   :  { %v792_v39 = vadd.f32 %v791_v35, %v790_v26  ;;  %v987_v40 = vadd.f32 %v986_v19, %v985_v36  ;;  %v998_v26 = vsel %vm687_vm1, %v910_v22, 0.0  ;;  %v912_v36 = vmul.f32 %v1844_v7, %v1844_v7  ;;  %746 = vst.msk [vmem:[%s2321_s4 + $0x1d0] sm:$0xff] %vm687_vm1, %v2086_v0 }
 0x10d   :  { %v794_v2 = vadd.f32 %v793_v45, %v792_v39  ;;  %v989_v51 = vadd.f32 %v988_v44, %v987_v40  ;;  %v2074_v37 = vpop.f32.mrf.mxu2  ;;  %v1000_v39 = vsel %vm687_vm1, %v911_v30, 0.0  ;;  %v913_v40 = vmul.f32 %v1871_v12, %v1871_v12 }
 0x10e   :  { %734 = vst.msk [vmem:[%s2321_s4 + $0x170] sm:$0xff] %vm687_vm1, %v2074_v37  ;;  %v1002_v7 = vsel %vm687_vm1, %v912_v36, 0.0 }
 0x10f   :  { %v991_v11 = vadd.f32 %v990_v3, %v989_v51  ;;  %v796_v14 = vadd.f32 %v795_v31, %v794_v2  ;;  %v914_v2 = vmul.f32 %v1906_v32, %v1906_v32  ;;  %v1004_v31 = vsel %vm687_vm1, %v913_v40, 0.0 }
 0x110   :  { %v917_v32 = vmul.f32 %v1668_v28, %v1668_v28 }
 0x111   :  { %v798_v18 = vadd.f32 %v797_v42, %v796_v14  ;;  %v993_v20 = vadd.f32 %v992_v38, %v991_v11  ;;  %v915_v11 = vmul.f32 %v1939_v62, %v1939_v62  ;;  %v916_v14 = vmul.f32 %v1972_v47, %v1972_v47 }
 0x112   :  { %v1006_v12 = vsel %vm687_vm1, %v914_v2, 0.0  ;;  %v2121_v62 = vpop.f32.mrf.mxu3 }
 0x113   :  { %v800_v9 = vadd.f32 %v799_v4, %v798_v18  ;;  %v995_v23 = vadd.f32 %v994_v54, %v993_v20  ;;  %v813_v18 = vsel %vm687_vm1, %v1972_v47, 0.0  ;;  %v1008_v22 = vsel %vm687_vm1, %v915_v11, 0.0  ;;  %747 = vst.msk [vmem:[%s2321_s4 + $0x1d8] sm:$0xff] %vm687_vm1, %v2121_v62 }
 0x114   :  { %v825_v11 = vsel %vm687_vm1, %v1788_v59, 0.0 }
 0x115   :  { %v802_v52 = vadd.f32 %v801_v25, %v800_v9  ;;  %v997_v33 = vadd.f32 %v996_v24, %v995_v23  ;;  %v2110_v4 = vpop.f32.mrf.mxu2  ;;  %v1010_v9 = vsel %vm687_vm1, %v916_v14, 0.0  ;;  %v815_v24 = vsel %vm687_vm1, %v1668_v28, 0.0 }
 0x116   :  { %735 = vst.msk [vmem:[%s2321_s4 + $0x178] sm:$0xff] %vm687_vm1, %v2110_v4  ;;  %v918_v25 = vmul.f32 %v1700_v41, %v1700_v41  ;;  %v819_v28 = vsel %vm687_vm1, %v1725_v48, 0.0  ;;  %v923_v14 = vmul.f32 %v1813_v63, %v1813_v63 }
 0x117   :  { %v804_v19 = vadd.f32 %v803_v56, %v802_v52  ;;  %v999_v35 = vadd.f32 %v998_v26, %v997_v33  ;;  %v1012_v33 = vsel %vm687_vm1, %v917_v32, 0.0  ;;  %v817_v26 = vsel %vm687_vm1, %v1700_v41, 0.0 }
 0x118   :  { %v919_v56 = vmul.f32 %v1725_v48, %v1725_v48  ;;  %v821_v41 = vsel %vm687_vm1, %v1745_v53, 0.0  ;;  %v925_v32 = vmul.f32 %v1863_v10, %v1863_v10 }
 0x119   :  { %v806_v44 = vadd.f32 %v805_v60, %v804_v19  ;;  %v1001_v45 = vadd.f32 %v1000_v39, %v999_v35  ;;  %v1014_v35 = vsel %vm687_vm1, %v918_v25, 0.0  ;;  %v920_v39 = vmul.f32 %v1745_v53, %v1745_v53 }
 0x11a   :  { %v922_v53 = vmul.f32 %v1788_v59, %v1788_v59  ;;  %v829_v59 = vsel %vm687_vm1, %v1838_v5, 0.0 }
 0x11b   :  { %v1003_v51 = vadd.f32 %v1002_v7, %v1001_v45  ;;  %v808_v3 = vadd.f32 %v807_v46, %v806_v44  ;;  %v1016_v44 = vsel %vm687_vm1, %v919_v56, 0.0  ;;  %v921_v45 = vmul.f32 %v1763_v55, %v1763_v55  ;;  %v2147_v7 = vpop.f32.mrf.mxu3 }
 0x11c   :  { %748 = vst.msk [vmem:[%s2321_s4 + $0x1e0] sm:$0xff] %vm687_vm1, %v2147_v7  ;;  %v1018_v48 = vsel %vm687_vm1, %v920_v39, 0.0 }
 0x11d   :  { %v1005_v38 = vadd.f32 %v1004_v31, %v1003_v51  ;;  %v810_v42 = vadd.f32 %v809_v58, %v808_v3  ;;  %v823_v51 = vsel %vm687_vm1, %v1763_v55, 0.0  ;;  %v1020_v58 = vsel %vm687_vm1, %v921_v45, 0.0 }
 0x11e   :  { %v827_v55 = vsel %vm687_vm1, %v1813_v63, 0.0  ;;  %v839_v45 = vsel %vm687_vm1, %v2006_v29, 0.0 }
 0x11f   :  { %v1007_v20 = vadd.f32 %v1006_v12, %v1005_v38  ;;  %v812_v54 = vadd.f32 %v811_v17, %v810_v42  ;;  %v1022_v12 = vsel %vm687_vm1, %v922_v53, 0.0  ;;  %v924_v17 = vmul.f32 %v1838_v5, %v1838_v5 }
 0x120   :  { %v926_v5 = vmul.f32 %v1898_v27, %v1898_v27  ;;  %v931_v53 = vmul.f32 %v2074_v37, %v2074_v37 }
 0x121   :  { %v1009_v47 = vadd.f32 %v1008_v22, %v1007_v20  ;;  %v814_v23 = vadd.f32 %v813_v18, %v812_v54  ;;  %v1024_v54 = vsel %vm687_vm1, %v923_v14, 0.0  ;;  %v1026_v63 = vsel %vm687_vm1, %v924_v17, 0.0 }
 0x122   :  { %v845_v14 = vsel %vm687_vm1, %v2110_v4, 0.0 }
 0x123   :  { %v816_v30 = vadd.f32 %v815_v24, %v814_v23  ;;  %v1011_v52 = vadd.f32 %v1010_v9, %v1009_v47  ;;  %v2174_v22 = vpop.f32.mrf.mxu3  ;;  %v831_v23 = vsel %vm687_vm1, %v1863_v10, 0.0  ;;  %v835_v10 = vsel %vm687_vm1, %v1931_v16, 0.0 }
 0x124   :  { %749 = vst.msk [vmem:[%s2321_s4 + $0x1e8] sm:$0xff] %vm687_vm1, %v2174_v22 }
 0x125   :  { %v818_v36 = vadd.f32 %v817_v26, %v816_v30  ;;  %v1013_v19 = vadd.f32 %v1012_v33, %v1011_v52  ;;  %v1028_v30 = vsel %vm687_vm1, %v925_v32, 0.0  ;;  %v833_v52 = vsel %vm687_vm1, %v1898_v27, 0.0 }
 0x126   :  { %v927_v33 = vmul.f32 %v1931_v16, %v1931_v16  ;;  %v837_v27 = vsel %vm687_vm1, %v1963_v43, 0.0 }
 0x127   :  { %v820_v60 = vadd.f32 %v819_v28, %v818_v36  ;;  %v1015_v40 = vadd.f32 %v1014_v35, %v1013_v19  ;;  %v1030_v36 = vsel %vm687_vm1, %v926_v5, 0.0  ;;  %v928_v19 = vmul.f32 %v1963_v43, %v1963_v43 }
 0x128   :  { %v1032_v39 = vsel %vm687_vm1, %v927_v33, 0.0  ;;  %v930_v43 = vmul.f32 %v2040_v15, %v2040_v15  ;;  %v937_v33 = vmul.f32 %v1873_v13, %v1873_v13 }
 0x129   :  { %v822_v46 = vadd.f32 %v821_v41, %v820_v60  ;;  %v1017_v2 = vadd.f32 %v1016_v44, %v1015_v40  ;;  %v929_v60 = vmul.f32 %v2006_v29, %v2006_v29  ;;  %v1034_v16 = vsel %vm687_vm1, %v928_v19, 0.0 }
 0x12a   :  { %v1038_v29 = vsel %vm687_vm1, %v930_v43, 0.0 }
 0x12b   :  { %v824_v3 = vadd.f32 %v823_v51, %v822_v46  ;;  %v1019_v31 = vadd.f32 %v1018_v48, %v1017_v2  ;;  %v2201_v40 = vpop.f32.mrf.mxu3  ;;  %v1036_v48 = vsel %vm687_vm1, %v929_v60, 0.0  ;;  %v841_v51 = vsel %vm687_vm1, %v2040_v15, 0.0 }
 0x12c   :  { %750 = vst.msk [vmem:[%s2321_s4 + $0x1f0] sm:$0xff] %vm687_vm1, %v2201_v40  ;;  %v933_v15 = vmul.f32 %v1771_v57, %v1771_v57 }
 0x12d   :  { %v826_v38 = vadd.f32 %v825_v11, %v824_v3  ;;  %v1021_v42 = vadd.f32 %v1020_v58, %v1019_v31  ;;  %v932_v3 = vmul.f32 %v2110_v4, %v2110_v4  ;;  %v843_v11 = vsel %vm687_vm1, %v2074_v37, 0.0 }
 0x12e   :  { %v847_v37 = vsel %vm687_vm1, %v1771_v57, 0.0  ;;  %v934_v4 = vmul.f32 %v1796_v61, %v1796_v61  ;;  %v1044_v32 = vsel %vm687_vm1, %v933_v15, 0.0  ;;  %v851_v57 = vsel %vm687_vm1, %v1821_v1, 0.0 }
 0x12f   :  { %v1023_v18 = vadd.f32 %v1022_v12, %v1021_v42  ;;  %v828_v20 = vadd.f32 %v827_v55, %v826_v38  ;;  %v1040_v12 = vsel %vm687_vm1, %v931_v53, 0.0  ;;  %v1042_v55 = vsel %vm687_vm1, %v932_v3, 0.0 }
 0x130   :  { %v1046_v5 = vsel %vm687_vm1, %v934_v4, 0.0  ;;  %v942_v53 = vmul.f32 %v2052_v49, %v2052_v49 }
 0x131   :  { %v830_v9 = vadd.f32 %v829_v59, %v828_v20  ;;  %v1025_v47 = vadd.f32 %v1024_v54, %v1023_v18 }
 0x133   :  { %v832_v24 = vadd.f32 %v831_v23, %v830_v9  ;;  %v1027_v25 = vadd.f32 %v1026_v63, %v1025_v47  ;;  %v2229_v17 = vpop.f32.mrf.mxu3  ;;  %v849_v9 = vsel %vm687_vm1, %v1796_v61, 0.0  ;;  %v935_v47 = vmul.f32 %v1821_v1, %v1821_v1 }
 0x134   :  { %751 = vst.msk [vmem:[%s2321_s4 + $0x1f8] sm:$0xff] %vm687_vm1, %v2229_v17  ;;  %v853_v61 = vsel %vm687_vm1, %v1846_v8, 0.0  ;;  %v855_v1 = vsel %vm687_vm1, %v1873_v13, 0.0  ;;  %v859_v13 = vsel %vm687_vm1, %v1941_v21, 0.0  ;;  %s1202_s4 = smov [#allocation2]  }
 0x135   :  { %v834_v26 = vadd.f32 %v833_v52, %v832_v24  ;;  %v1029_v56 = vadd.f32 %v1028_v30, %v1027_v25  ;;  %v936_v24 = vmul.f32 %v1846_v8, %v1846_v8  ;;  %v1048_v52 = vsel %vm687_vm1, %v935_v47, 0.0  ;;  %s1093_s24 = sshll.u32 %s1202_s4, 4  ;;  %s1094_s24 = int_to_ptr.vmem [resolvable:$true] %s1093_s24 }
 0x136   :  { %v857_v8 = vsel %vm687_vm1, %v1908_v34, 0.0  ;;  %v947_v47 = vmul.f32 %v2201_v40, %v2201_v40 }
 0x137   :  { %v836_v35 = vadd.f32 %v835_v10, %v834_v26  ;;  %v1031_v28 = vadd.f32 %v1030_v36, %v1029_v56  ;;  %v1050_v36 = vsel %vm687_vm1, %v936_v24, 0.0  ;;  %v938_v10 = vmul.f32 %v1908_v34, %v1908_v34 }
 0x138   :  { %v861_v34 = vsel %vm687_vm1, %v1974_v50, 0.0  ;;  %v877_v24 = vsel %vm687_vm1, %v2229_v17, 0.0 }
 0x139   :  { %v838_v44 = vadd.f32 %v837_v27, %v836_v35  ;;  %v1033_v41 = vadd.f32 %v1032_v39, %v1031_v28  ;;  %v1052_v28 = vsel %vm687_vm1, %v937_v33, 0.0  ;;  %v939_v39 = vmul.f32 %v1941_v21, %v1941_v21 }
 0x13a   :  { %v863_v21 = vsel %vm687_vm1, %v2018_v6, 0.0 }
 0x13b   :  { %v1035_v46 = vadd.f32 %v1034_v16, %v1033_v41  ;;  %v840_v2 = vadd.f32 %v839_v45, %v838_v44  ;;  %v1054_v44 = vsel %vm687_vm1, %v938_v10, 0.0  ;;  %v940_v41 = vmul.f32 %v1974_v50, %v1974_v50 }
 0x13c   :  { %v1056_v43 = vsel %vm687_vm1, %v939_v39, 0.0  ;;  %v865_v50 = vsel %vm687_vm1, %v2052_v49, 0.0  ;;  %v869_v49 = vsel %vm687_vm1, %v2121_v62, 0.0 }
 0x13d   :  { %v1037_v31 = vadd.f32 %v1036_v48, %v1035_v46  ;;  %v842_v58 = vadd.f32 %v841_v51, %v840_v2  ;;  %v941_v46 = vmul.f32 %v2018_v6, %v2018_v6  ;;  %v1058_v51 = vsel %vm687_vm1, %v940_v41, 0.0 }
 0x13e   :  { %v867_v6 = vsel %vm687_vm1, %v2086_v0, 0.0 }
 0x13f   :  { %v1039_v38 = vadd.f32 %v1038_v29, %v1037_v31  ;;  %v844_v42 = vadd.f32 %v843_v11, %v842_v58  ;;  %v1060_v58 = vsel %vm687_vm1, %v941_v46, 0.0  ;;  %v943_v29 = vmul.f32 %v2086_v0, %v2086_v0 }
 0x140   :  { %v871_v0 = vsel %vm687_vm1, %v2147_v7, 0.0 }
 0x141   :  { %v1041_v18 = vadd.f32 %v1040_v12, %v1039_v38  ;;  %v846_v20 = vadd.f32 %v845_v14, %v844_v42  ;;  %v1062_v38 = vsel %vm687_vm1, %v942_v53, 0.0  ;;  %v944_v42 = vmul.f32 %v2121_v62, %v2121_v62 }
 0x142   :  { %v873_v62 = vsel %vm687_vm1, %v2174_v22, 0.0 }
 0x143   :  { %v848_v54 = vadd.f32 %v847_v37, %v846_v20  ;;  %v1043_v59 = vadd.f32 %v1042_v55, %v1041_v18  ;;  %v1064_v55 = vsel %vm687_vm1, %v943_v29, 0.0  ;;  %v945_v18 = vmul.f32 %v2147_v7, %v2147_v7 }
 0x144   :  { %v1066_v4 = vsel %vm687_vm1, %v944_v42, 0.0 }
 0x145   :  { %v850_v63 = vadd.f32 %v849_v9, %v848_v54  ;;  %v1045_v23 = vadd.f32 %v1044_v32, %v1043_v59  ;;  %v946_v54 = vmul.f32 %v2174_v22, %v2174_v22  ;;  %v1068_v9 = vsel %vm687_vm1, %v945_v18, 0.0 }
 0x146   :  { %v1072_v22 = vsel %vm687_vm1, %v947_v47, 0.0 }
 0x147   :  { %v852_v25 = vadd.f32 %v851_v57, %v850_v63  ;;  %v1047_v30 = vadd.f32 %v1046_v5, %v1045_v23  ;;  %v948_v63 = vmul.f32 %v2229_v17, %v2229_v17  ;;  %v1070_v7 = vsel %vm687_vm1, %v946_v54, 0.0 }
 0x148   :  { %v875_v57 = vsel %vm687_vm1, %v2201_v40, 0.0 }
 0x149   :  { %v854_v26 = vadd.f32 %v853_v61, %v852_v25  ;;  %v1049_v56 = vadd.f32 %v1048_v52, %v1047_v30  ;;  %v1074_v52 = vsel %vm687_vm1, %v948_v63, 0.0 }
 0x14b   :  { %v856_v19 = vadd.f32 %v855_v1, %v854_v26  ;;  %v1051_v35 = vadd.f32 %v1050_v36, %v1049_v56 }
 0x14d   :  { %v858_v27 = vadd.f32 %v857_v8, %v856_v19  ;;  %v1053_v60 = vadd.f32 %v1052_v28, %v1051_v35 }
 0x14f   :  { %v1055_v16 = vadd.f32 %v1054_v44, %v1053_v60  ;;  %v860_v45 = vadd.f32 %v859_v13, %v858_v27 }
 0x151   :  { %v862_v2 = vadd.f32 %v861_v34, %v860_v45  ;;  %v1057_v48 = vadd.f32 %v1056_v43, %v1055_v16 }
 0x153   :  { %v864_v3 = vadd.f32 %v863_v21, %v862_v2  ;;  %v1059_v31 = vadd.f32 %v1058_v51, %v1057_v48 }
 0x155   :  { %v866_v11 = vadd.f32 %v865_v50, %v864_v3  ;;  %v1061_v14 = vadd.f32 %v1060_v58, %v1059_v31 }
 0x157   :  { %v868_v15 = vadd.f32 %v867_v6, %v866_v11  ;;  %v1063_v12 = vadd.f32 %v1062_v38, %v1061_v14 }
 0x159   :  { %v870_v20 = vadd.f32 %v869_v49, %v868_v15  ;;  %v1065_v37 = vadd.f32 %v1064_v55, %v1063_v12 }
 0x15b   :  { %v1067_v59 = vadd.f32 %v1066_v4, %v1065_v37  ;;  %v872_v32 = vadd.f32 %v871_v0, %v870_v20 }
 0x15d   :  { %v1069_v23 = vadd.f32 %v1068_v9, %v1067_v59  ;;  %v874_v5 = vadd.f32 %v873_v62, %v872_v32 }
 0x15f   :  { %v1071_v25 = vadd.f32 %v1070_v7, %v1069_v23  ;;  %v876_v30 = vadd.f32 %v875_v57, %v874_v5 }
 0x161   :  { %v1073_v61 = vadd.f32 %v1072_v22, %v1071_v25  ;;  %v878_v33 = vadd.f32 %v877_v24, %v876_v30 }
 0x163   :  { %v879_v26 = vrot.slane %v878_v33, 4  ;;  %v1075_v56 = vadd.f32 %v1074_v52, %v1073_v61 }
 0x165   :  { %v880_v36 = vadd.f32 %v879_v26, %v878_v33  ;;  %v1076_v1 = vrot.slane %v1075_v56, 4 }
 0x167   :  { %v881_v10 = vrot.slane %v880_v36, 2  ;;  %v1077_v19 = vadd.f32 %v1076_v1, %v1075_v56 }
 0x169   :  { %v882_v35 = vadd.f32 %v881_v10, %v880_v36  ;;  %v1078_v28 = vrot.slane %v1077_v19, 2 }
 0x16b   :  { %v883_v40 = vrot.slane %v882_v35, 1  ;;  %v1079_v8 = vadd.f32 %v1078_v28, %v1077_v19 }
 0x16d   :  { %v1080_v39 = vrot.slane %v1079_v8, 1  ;;  %v884_v17 = vadd.f32 %v883_v40, %v882_v35 }
 0x16f   :  { %v1081_v27 = vadd.f32 %v1080_v39, %v1079_v8 }
 0x171   :  { %v1083_v60 = vsel %vm1082_vm2, %v884_v17, %v1081_v27 }
 0x172   :  { %1085 = vst.msk [vmem:[#allocation2] sm:$0x3] %vm1084_vm3, %v1083_v60 }
 0x173   :  { %1098 = dma.vmem_to_hbm [thread:$0]  %s1094_s24, 32, %s1096_s27, [#allocation3]  }
 0x174   :  { %1200 = dma.done.wait [#allocation3], 32  }
 0x175   :  { %1201 = vsyncadd [#allocation3], 4294967264 }
 0x176   :  { %1105 = vsyncpa [#allocation3], 1 }

</bundles_post_ra>
